<compile_context>
chip_gen: v7x
topology: tpu7x:2x2x1
jax: 0.10.0
libtpu: 0.0.40
codegen_flags: <defaults>
</compile_context>

<pallas_src>
from functools import partial

import numpy as np
import jax
import jax.numpy as jnp
from jax import lax
from jax.experimental import pallas as pl
from jax.experimental.pallas import tpu as pltpu


# ----------------------------------------------------------------------------- #
# Encoder kernel: stand-in backbone conv (im2col matmul, bf16 inputs) + ReLU
# + AdaptiveAvgPool2d((3,3)) expressed as a (9, 36) pooling matrix.
# grid = (B,), batch axis "parallel" (sharded across TCs on v7x).
# ----------------------------------------------------------------------------- #
def encoder_kernel(patches_ref, wc_ref, bc_ref, pool_ref, out_ref):
    # patches_ref: (1, 36, 27) f32  wc_ref: (27, C) bf16  bc_ref: (1, C) f32
    # pool_ref:    (9, 36) f32      out_ref: (1, 9, C) f32
    conv = jnp.dot(patches_ref[0].astype(jnp.bfloat16), wc_ref[...],
                   preferred_element_type=jnp.float32) + bc_ref[...]
    conv = jnp.maximum(conv, 0.0)                                  # ReLU backbone output
    out_ref[0] = jnp.dot(pool_ref[...], conv,
                         preferred_element_type=jnp.float32)       # adaptive avg pool


def encoder_forward(images, wc_t, bc_conv, pool_mat):
    """images NCHW (B,3,12,12) -> pooled features (B, 9, C) (pos-major layout)."""
    B = images.shape[0]
    C = wc_t.shape[1]
    # im2col for a 3x3 / stride-2 / pad-1 conv: 12x12 -> 6x6 output positions.
    xp = jnp.pad(images, ((0, 0), (0, 0), (1, 1), (1, 1)))
    pats = jnp.stack([xp[:, :, ky:ky + 11:2, kx:kx + 11:2]
                      for ky in range(3) for kx in range(3)], axis=2)   # (B,3,9,6,6)
    patches = pats.reshape(B, 27, 36).transpose(0, 2, 1)                # (B,36,27)

    pooled = pl.pallas_call(
        encoder_kernel,
        out_shape=jax.ShapeDtypeStruct((B, 9, C), jnp.float32),
        grid=(B,),
        in_specs=[
            pl.BlockSpec((1, 36, 27), lambda b: (b, 0, 0)),
            pl.BlockSpec((27, C), lambda b: (0, 0)),
            pl.BlockSpec((1, C), lambda b: (0, 0)),
            pl.BlockSpec((9, 36), lambda b: (0, 0)),
        ],
        out_specs=pl.BlockSpec((1, 9, C), lambda b: (b, 0, 0)),
        compiler_params=pltpu.CompilerParams(dimension_semantics=("parallel",)),
    )(patches, wc_t, bc_conv, pool_mat)
    return pooled  # PyTorch's channel-major flatten is folded into w1_pm on host.


# ----------------------------------------------------------------------------- #
# fc1 kernel: relu(fc1(features)) tiled over the 18432-wide K axis so the bf16
# weight-chunk DMAs pipeline under the matmuls (BlockSpec auto double-buffering).
# ----------------------------------------------------------------------------- #
def fc1_kernel(x_ref, w_ref, b_ref, o_ref, acc_ref):
    @pl.when(pl.program_id(0) == 0)
    def _():
        acc_ref[...] = jnp.zeros_like(acc_ref)

    acc_ref[...] += jnp.dot(x_ref[...].astype(jnp.bfloat16), w_ref[...],
                            preferred_element_type=jnp.float32)

    @pl.when(pl.program_id(0) == pl.num_programs(0) - 1)
    def _():
        o_ref[...] = jnp.maximum(acc_ref[...] + b_ref[...], 0.0)   # relu(fc1(x))


def fc1_forward(feats_pm, w1_pm, b1, *, tk=2048):
    B, FH = feats_pm.shape
    H = w1_pm.shape[1]
    assert FH % tk == 0
    nk = FH // tk
    return pl.pallas_call(
        fc1_kernel,
        out_shape=jax.ShapeDtypeStruct((B, H), jnp.float32),
        grid=(nk,),
        in_specs=[
            pl.BlockSpec((B, tk), lambda k: (0, k)),
            pl.BlockSpec((tk, H), lambda k: (k, 0)),
            pl.BlockSpec((1, H), lambda k: (0, 0)),
        ],
        out_specs=pl.BlockSpec((B, H), lambda k: (0, 0)),
        scratch_shapes=[pltpu.VMEM((B, H), jnp.float32)],
        compiler_params=pltpu.CompilerParams(dimension_semantics=("arbitrary",)),
    )(feats_pm, w1_pm, b1)


# ----------------------------------------------------------------------------- #
# Decoder kernel: DecoderRNN.forward after fc1 (init_h/c, LayerNorm, fused
# LSTMCells, fc, argmax -> embedding / totoken lookups, 15-step caption loop).
# Gridless; all (small) weights live in VMEM; loop fully unrolled.
# ----------------------------------------------------------------------------- #
def decoder_kernel(feat_ref,
                   wih_ref, bih_ref, wic_ref, bic_ref,
                   gh_ref, bh_ref, gc_ref, bc_ref,
                   wl1_ref, bl1_ref, wl2_ref, bl2_ref,
                   wf_ref, bf_ref, emb_ref, tok_ref,
                   out_ref, *, max_length):
    B, H = feat_ref.shape
    V = bf_ref.shape[-1]
    TPAD = out_ref.shape[-1]
    f32, bf16 = jnp.float32, jnp.bfloat16

    # ---- hoist all parameter loads + broadcasts out of the caption loop ----
    wih = wih_ref[...]
    wic = wic_ref[...]
    bih = jnp.broadcast_to(bih_ref[...], (B, H))
    bic = jnp.broadcast_to(bic_ref[...], (B, H))
    gh = jnp.broadcast_to(gh_ref[...], (B, H))
    bh = jnp.broadcast_to(bh_ref[...], (B, H))
    gc = jnp.broadcast_to(gc_ref[...], (B, H))
    bc = jnp.broadcast_to(bc_ref[...], (B, H))
    wl1 = wl1_ref[...]
    bl1 = jnp.broadcast_to(bl1_ref[...], (B, 4 * H))
    wl2 = wl2_ref[...]
    bl2 = jnp.broadcast_to(bl2_ref[...], (B, 4 * H))
    wf = wf_ref[...]
    bfv = jnp.broadcast_to(bf_ref[...], (B, V))
    emb = emb_ref[...]
    tok = tok_ref[...]

    lane_v = lax.broadcasted_iota(jnp.int32, (B, V), 1)
    lane_t = lax.broadcasted_iota(jnp.int32, (B, TPAD), 1)

    def layernorm(x, g, b):
        mu = jnp.mean(x, axis=-1, keepdims=True)
        var = jnp.mean(jnp.square(x - mu), axis=-1, keepdims=True)
        return (x - mu) * lax.rsqrt(var + 1e-5) * g + b

    def lstm(x, hprev, cprev, w, b):
        # Fused cell: [x, h] @ [Wi; Wh] + (bi + bh)  => one MXU push per cell.
        xh = jnp.concatenate([x, hprev], axis=-1).astype(bf16)           # (B, 2H)
        gates = jnp.dot(xh, w, preferred_element_type=f32) + b           # (B, 4H)
        i = jax.nn.sigmoid(gates[:, 0 * H:1 * H])
        f = jax.nn.sigmoid(gates[:, 1 * H:2 * H])
        g = jnp.tanh(gates[:, 2 * H:3 * H])
        o = jax.nn.sigmoid(gates[:, 3 * H:4 * H])
        c_new = f * cprev + i * g
        h_new = o * jnp.tanh(c_new)
        return h_new, c_new

    def predict(h3):
        # prediction = fc(dropout(h3));  dropout == identity
        pred = jnp.dot(h3.astype(bf16), wf, preferred_element_type=f32) + bfv   # (B, V)
        maxv = jnp.max(pred, axis=-1, keepdims=True)
        idx = jnp.min(jnp.where(pred == maxv, lane_v, V),
                      axis=-1, keepdims=True)                                   # first-argmax
        onehot = (lane_v == idx).astype(f32)                                    # (B, V)
        word = jnp.dot(onehot.astype(bf16), emb,
                       preferred_element_type=f32)                              # embed(argmax)
        # totoken(argmax)[0] -> row 0 of the (B,B) lookup, as a (B,1) column
        tok_col = jnp.sum(tok * onehot[0:1, :], axis=-1, keepdims=True)         # (B, 1)
        return word, tok_col

    # features = relu(fc1(features)) was computed in the tiled fc1 kernel.
    feats = feat_ref[...]
    # h = dropout(ln_h(relu(init_h(features)))) ; c likewise (dropout == identity)
    h = layernorm(jnp.maximum(
        jnp.dot(feats, wih, preferred_element_type=f32) + bih, 0.0), gh, bh)
    c = layernorm(jnp.maximum(
        jnp.dot(feats, wic, preferred_element_type=f32) + bic, 0.0), gc, bc)

    h1, c1 = lstm(feats, h, c, wl1, bl1)
    h2, c2 = lstm(h1, h, c, wl2, bl2)
    h3, c3 = lstm(h2, h, c, wl2, bl2)          # decode_step2 weights reused (as in PyTorch)
    word, tok_col = predict(h3)
    res = tok_col * (lane_t == 0).astype(f32)  # res_caption[:, 0]

    # Fixed caption loop, fully unrolled (static trip count): LLO sees across
    # iterations, and (lane_t == t) folds to a constant mask per step.
    for t in range(1, max_length):
        h1, c1 = lstm(word,
                      layernorm(h1, gh, bh) + h,       # ln_h(h1) + h  (initial h, per spec)
                      layernorm(c1, gc, bc) + c,       # ln_c(c1) + c  (initial c, per spec)
                      wl1, bl1)
        h2, c2 = lstm(h1, h2, c2, wl2, bl2)
        h3, c3 = lstm(h2, h3, c3, wl2, bl2)
        word, tok_col = predict(h3)
        res = res + tok_col * (lane_t == t).astype(f32)  # res_caption[:, t]

    out_ref[...] = res                                    # lane-dense (B, TPAD) store


def run_decoder(feats, p, max_length=15):
    B = feats.shape[0]
    TPAD = ((max_length + 127) // 128) * 128   # lane-dense output; sliced below
    out = pl.pallas_call(
        partial(decoder_kernel, max_length=max_length),
        out_shape=jax.ShapeDtypeStruct((B, TPAD), jnp.float32),
    )(feats,
      p['wih_t'], p['bih'], p['wic_t'], p['bic'],
      p['gh'], p['bh'], p['gc'], p['bc_ln'],
      p['wl1'], p['bl1'], p['wl2'], p['bl2'],
      p['wf_t'], p['bf'], p['emb'], p['tok_t'])
    return out[:, :max_length]


def cnn_to_rnn_forward(images, params, max_length=15):
    pooled = encoder_forward(images, params['wc_t'], params['bc_conv'], params['pool'])
    B = pooled.shape[0]
    feats_flat = pooled.reshape(B, -1)         # pos-major flatten, matched by w1_pm ordering
    feats = fc1_forward(feats_flat, params['w1_pm'], params['b1'])
    return run_decoder(feats, params, max_length)


# ----------------------------------------------------------------------------- #
# Deterministic synthetic parameters (shapes follow the PyTorch module; weights
# are stored pre-transposed / pre-fused so kernels compute x @ W directly).
# ----------------------------------------------------------------------------- #
def init_params(key, B, H, V, C):
    keys = iter(jax.random.split(key, 32))

    def rnd(shape, scale=0.1):
        return jax.random.normal(next(keys), shape, jnp.float32) * scale

    FH = C * 3 * 3  # 2048*3*3 = 18432, hardcoded in DecoderRNN.fc1

    # adaptive-avg-pool (6x6 -> 3x3) as a matrix
    P = np.zeros((9, 36), np.float32)
    for by in range(3):
        for bx in range(3):
            for dy in range(2):
                for dx in range(2):
                    P[by * 3 + bx, (2 * by + dy) * 6 + (2 * bx + dx)] = 0.25

    # fc1 weight in PyTorch flatten order (index = c*9 + pos), re-ordered to
    # pos-major (pos*C + c) so the kernel consumes pooled.reshape(B, 9*C) directly.
    w1_py = rnd((FH, H), 0.01)
    w1_pm = (w1_py.reshape(C, 9, H).transpose(1, 0, 2)
             .reshape(9 * C, H).astype(jnp.bfloat16))

    # LSTMCell weights, transposed to (in, 4H), gate order i,f,g,o; fused [Wi; Wh].
    wi1, wh1 = rnd((H, 4 * H)), rnd((H, 4 * H))
    bi1, bhh1 = rnd((1, 4 * H)), rnd((1, 4 * H))
    wi2, wh2 = rnd((H, 4 * H)), rnd((H, 4 * H))
    bi2, bhh2 = rnd((1, 4 * H)), rnd((1, 4 * H))

    return dict(
        # encoder stand-in conv (PyTorch (C,3,3,3) flattened + transposed), bf16
        wc_t=rnd((27, C), 0.05).astype(jnp.bfloat16),
        bc_conv=rnd((1, C), 0.05),
        pool=jnp.asarray(P),
        # fc1: Linear(2048*3*3, H) — pos-major, bf16
        w1_pm=w1_pm, b1=rnd((1, H)),
        # init_h / init_c: Linear(encoder_dim=H, H)
        wih_t=rnd((H, H)), bih=rnd((1, H)),
        wic_t=rnd((H, H)), bic=rnd((1, H)),
        # ln_h / ln_c
        gh=1.0 + rnd((1, H)), bh=rnd((1, H)),
        gc=1.0 + rnd((1, H)), bc_ln=rnd((1, H)),
        # decode_step : LSTMCell(embed=H, H)  — fused weight (2H,4H) bf16, fused bias
        wl1=jnp.concatenate([wi1, wh1], axis=0).astype(jnp.bfloat16),
        bl1=bi1 + bhh1,
        # decode_step2: LSTMCell(H, H)
        wl2=jnp.concatenate([wi2, wh2], axis=0).astype(jnp.bfloat16),
        bl2=bi2 + bhh2,
        # fc: Linear(H, V)
        wf_t=rnd((H, V)).astype(jnp.bfloat16), bf=rnd((1, V)),
        # embed: Embedding(V, H)
        emb=rnd((V, H)).astype(jnp.bfloat16),
        # totoken: Embedding.from_pretrained(weight), weight (V, B) — its dim must
        # equal the batch size for `res_caption[:, t] = totoken(...)[0]` to be valid.
        tok_t=rnd((B, V)),   # stored transposed: tok_t[b, v] = weight[v, b]
    )


if __name__ == "__main__":
    B, H, V, C = 2, 32, 64, 2048   # embed_size == hidden_size == 32 (required by the module)
    key = jax.random.PRNGKey(0)
    kimg, kparam = jax.random.split(key)
    images = jax.random.normal(kimg, (B, 3, 12, 12), jnp.float32)   # NCHW
    params = init_params(kparam, B=B, H=H, V=V, C=C)

    out = cnn_to_rnn_forward(images, params, max_length=15)
    out = jax.block_until_ready(out)
    assert out.shape == (B, 15) and out.dtype == jnp.float32
    print("KERNEL_OK")
</pallas_src>

<mosaic_0001>
module attributes {stable_mosaic.version = 11 : i64} {
  func.func @encoder_kernel(%arg0: i32, %arg1: memref<1x36x27xf32, #tpu.memory_space<vmem>>, %arg2: memref<27x2048xbf16, #tpu.memory_space<vmem>>, %arg3: memref<1x2048xf32, #tpu.memory_space<vmem>>, %arg4: memref<9x36xf32, #tpu.memory_space<vmem>>, %arg5: memref<1x9x2048xf32, #tpu.memory_space<vmem>>) attributes {dimension_semantics = [#tpu.dimension_semantics<parallel>], iteration_bounds = array<i64: 2>, scalar_prefetch = 0 : i64, scratch_operands = 0 : i64, tpu.core_type = #tpu.core_type<tc>, window_params = [{transform_indices = @transform_0, window_bounds = array<i64: 1, 36, 27>}, {pipeline_mode = #tpu.pipeline_mode<synchronous>, transform_indices = @transform_1, window_bounds = array<i64: 27, 2048>}, {pipeline_mode = #tpu.pipeline_mode<synchronous>, transform_indices = @transform_2, window_bounds = array<i64: 1, 2048>}, {pipeline_mode = #tpu.pipeline_mode<synchronous>, transform_indices = @transform_3, window_bounds = array<i64: 9, 36>}, {transform_indices = @transform_4, window_bounds = array<i64: 1, 9, 2048>}]} {
    %c0 = arith.constant 0 : index
    %c0_0 = arith.constant 0 : index
    %c0_1 = arith.constant 0 : index
    %0 = vector.load %arg1[%c0, %c0_0, %c0_1] : memref<1x36x27xf32, #tpu.memory_space<vmem>>, vector<1x36x27xf32>
    %1 = vector.shape_cast %0 : vector<1x36x27xf32> to vector<36x27xf32>
    %2 = arith.truncf %1 : vector<36x27xf32> to vector<36x27xbf16>
    %c0_2 = arith.constant 0 : index
    %c0_3 = arith.constant 0 : index
    %3 = vector.load %arg2[%c0_2, %c0_3] : memref<27x2048xbf16, #tpu.memory_space<vmem>>, vector<27x2048xbf16>
    %cst = arith.constant dense<0.000000e+00> : vector<36x2048xf32>
    %4 = tpu.matmul %2, %3, %cst {dimension_numbers = #tpu.dot_dimension_numbers<[1], [0], [0], [1], [0, 0, 1, 1], [], []>} : vector<36x27xbf16>, vector<27x2048xbf16>, vector<36x2048xf32> -> vector<36x2048xf32>
    %c0_4 = arith.constant 0 : index
    %c0_5 = arith.constant 0 : index
    %5 = vector.load %arg3[%c0_4, %c0_5] : memref<1x2048xf32, #tpu.memory_space<vmem>>, vector<1x2048xf32>
    %6 = vector.broadcast %5 : vector<1x2048xf32> to vector<36x2048xf32>
    %7 = arith.addf %4, %6 : vector<36x2048xf32>
    %cst_6 = arith.constant 0.000000e+00 : f32
    %8 = vector.broadcast %cst_6 : f32 to vector<36x2048xf32>
    %9 = arith.maximumf %7, %8 : vector<36x2048xf32>
    %c0_7 = arith.constant 0 : index
    %c0_8 = arith.constant 0 : index
    %10 = vector.load %arg4[%c0_7, %c0_8] : memref<9x36xf32, #tpu.memory_space<vmem>>, vector<9x36xf32>
    %cst_9 = arith.constant dense<0.000000e+00> : vector<9x2048xf32>
    %11 = tpu.matmul %10, %9, %cst_9 {dimension_numbers = #tpu.dot_dimension_numbers<[1], [0], [0], [1], [0, 0, 1, 1], [], []>} : vector<9x36xf32>, vector<36x2048xf32>, vector<9x2048xf32> -> vector<9x2048xf32>
    %c0_10 = arith.constant 0 : index
    %c0_11 = arith.constant 0 : index
    %c0_12 = arith.constant 0 : index
    %12 = vector.load %arg5[%c0_10, %c0_11, %c0_12] : memref<1x9x2048xf32, #tpu.memory_space<vmem>>, vector<1x9x2048xf32>
    %13 = vector.shape_cast %12 : vector<1x9x2048xf32> to vector<9x2048xf32>
    %14 = vector.shape_cast %11 : vector<9x2048xf32> to vector<1x9x2048xf32>
    tpu.vector_store %arg5[%c0_10, %c0_11, %c0_12], %14 {strides = array<i32>} : memref<1x9x2048xf32, #tpu.memory_space<vmem>>, vector<1x9x2048xf32>,
    return
  }
  func.func @transform_0(%arg0: i32) -> (i32, i32, i32) {
    %c0_i32 = arith.constant 0 : i32
    %c0_i32_0 = arith.constant 0 : i32
    %c0_i32_1 = arith.constant 0 : i32
    return %arg0, %c0_i32, %c0_i32_0 : i32, i32, i32
  }
  func.func @transform_1(%arg0: i32) -> (i32, i32) {
    %c0_i32 = arith.constant 0 : i32
    %c0_i32_0 = arith.constant 0 : i32
    %c0_i32_1 = arith.constant 0 : i32
    return %c0_i32, %c0_i32_0 : i32, i32
  }
  func.func @transform_2(%arg0: i32) -> (i32, i32) {
    %c0_i32 = arith.constant 0 : i32
    %c0_i32_0 = arith.constant 0 : i32
    %c0_i32_1 = arith.constant 0 : i32
    return %c0_i32, %c0_i32_0 : i32, i32
  }
  func.func @transform_3(%arg0: i32) -> (i32, i32) {
    %c0_i32 = arith.constant 0 : i32
    %c0_i32_0 = arith.constant 0 : i32
    %c0_i32_1 = arith.constant 0 : i32
    return %c0_i32, %c0_i32_0 : i32, i32
  }
  func.func @transform_4(%arg0: i32) -> (i32, i32, i32) {
    %c0_i32 = arith.constant 0 : i32
    %c0_i32_0 = arith.constant 0 : i32
    %c0_i32_1 = arith.constant 0 : i32
    return %arg0, %c0_i32, %c0_i32_0 : i32, i32, i32
  }
}

</mosaic_0001>

<bundles_post_ra>
// kernel: tpu_custom_call.1
= control target key start
LH: loop header
LB: loop body
LE: loop exit
PB: predicated region body
PF: predicated region fallthrough
CT: control target
= control target key end

     0   :  { %9 = vsyncpa [#allocation3], 0  ;;  %s2146_s15 = smov 0   ;;  %s2597_s0 = inlined_call_operand.vmem [shape: f32[2,36,27], index: 0, kind: input, shape index: {}]   ;;  %s2598_s1 = inlined_call_operand.hbm [shape: bf16[27,2048], index: 1, kind: input, shape index: {}]   ;;  %s2599_s2 = inlined_call_operand.vmem [shape: f32[1,2048], index: 2, kind: input, shape index: {}]   ;;  %s2600_s3 = inlined_call_operand.vmem [shape: f32[9,36], index: 3, kind: input, shape index: {}]   ;;  %s2601_s4 = inlined_call_operand.vmem [shape: f32[2,9,2048], index: 4, kind: output, shape index: {}]  }
   0x1 LB: > { %s2152_s16 = sadd.s32 4294967295, %s2113_s15   ;;  %p1887_p0 = scmp.ge.s32.totalorder %s2113_s15, 1  ;;  %s2113_s15 = sphi %s2146_s15, %s15_s15  }
   0x2   : > { %p135_p1 = scmp.lt.s32.totalorder %s2113_s15, 3  ;;  %s2115_s17 = smov [#allocation2]  }
   0x3   : > { %s147_s18 = sshll.u32 %s2115_s17, 4  ;;  %p2602_p3 = scmp.eq.s32.totalorder %s2152_s16, 0  ;;  %s148_s18 = int_to_ptr.vmem [resolvable:$true] %s147_s18 }
   0x4   : > { %p2156_p2 = pnand %p1887_p0, %p135_p1  ;;  %s2075_s23 = scalar_lea.hbm %s2598_s1, 4096 }
   0x5   : > { %p2076_p6 = scmp.ne.s32.totalorder %s2598_s1, %s2075_s23  ;;  %p2082_p10 = scmp.lt.u32.totalorder %s2075_s23, %s2598_s1 }
   0x6   : > { %s2604_s19 = scalar_select %p2156_p2, 1, 0 }
   0x7   : > { %p2055_p4 = pneg %p2156_p2 }
   0x9   : > { %p2165_p5 = pnand %p2602_p3, %p2055_p4 }
   0xb   : > { %p2077_p7 = pneg %p2165_p5 }
   0xd   : > { %p2078_p8 = pnand %p2077_p7, %p2076_p6 }
   0xf   : > { %p2079_p9 = pneg %p2078_p8 }
  0x11   : > { %p2084_p11 = pnand %p2082_p10, %p2079_p9 }
  0x13   : > { %2087 = shalt.err (!%p2084_p11)
}
  0x14   : > { %s2088_s28 = scalar_lea.vmem %s148_s18, 4096  ;;  %p2096_p1 = scmp.lt.s32.totalorder %s148_s18, %s148_s18 }
  0x15   : > { %p2089_p12 = scmp.ne.s32.totalorder %s148_s18, %s2088_s28  ;;  %p2097_p4 = scmp.lt.s32.totalorder %s2088_s28, %s2088_s28 }
  0x17   : > { %p2091_p13 = pnand %p2089_p12, %p2077_p7  ;;  %p2098_p3 = por %p2097_p4, %p2096_p1 }
  0x19   : > { %p2092_p0 = pneg %p2091_p13 }
  0x1b   : > { %p2099_p2 = pnand %p2098_p3, %p2092_p0 }
  0x1d   : > { %2102 = shalt.err (!%p2099_p2)
}
  0x1e   : > { %s2116_s29 = smov 1024   ;;  %s2117_s30 = smov 64  }
  0x1f   : > { %2058 = dma.hbm_to_vmem [thread:$0]  (!%p2165_p5), %s2598_s1, 4096, %s148_s18, [#allocation3], %s2116_s29, %s2116_s29, %s2117_s30  }
  0x20   : > { %p2606_p6 = scmp.ne.s32.totalorder %s2604_s19, 0 }
  0x21   : > { %p2607_p8 = scmp.eq.s32.totalorder (!%p2606_p6), %s2152_s16, 0 }
  0x22   : > { %177 = sbr.rel (%p2606_p6) target bundleno = 580 (0x244), region = 36 }
  0x29   : > { %2108 = dma.done.wait (%p2607_p8), [#allocation3], 4096   ;;  %p2608_p7 = pmov %p2607_p8 }
  0x2a   : > { %v2118_v0 = vmov 0   ;;  %p203_p2 = scmp.lt.s32.totalorder %s2152_s16, 1  ;;  %vm492_vm0 = vcmask 1044480   ;;  %vm493_vm1 = vcmask 1045504   ;;  %v2119_v1 = vmov 65535   ;;  %v222_v3 = vld [vmem:[#allocation2] sm:$0xff] }
  0x2b   : > { %2110 = vsyncadd (%p2608_p7), [#allocation3], 4294963200  ;;  %576 = vmatprep.mubr.bf16.mxu0 %v2118_v0  ;;  %637 = vmatprep.mubr.bf16.mxu1 %v2118_v0  ;;  %v494_v2 = vsel %vm492_vm0, 4294967295, %v2119_v1  ;;  %v230_v4 = vld [vmem:[#allocation2 + $0x40] sm:$0xff]  ;;  %v223_v5 = vld [vmem:[#allocation2 + $0x8] sm:$0xff]  ;;  %vm482_vm2 = vcmask 220160  }
  0x2c   : > { %s2610_s16 = smov (!%p203_p2, %s2152_s16), 1  ;;  %v1896_v6 = vcombine.high %v222_v3, %v230_v4  ;;  %v231_v7 = vld [vmem:[#allocation2 + $0x48] sm:$0xff]  ;;  %v1895_v8 = vcombine.low %v222_v3, %v230_v4  ;;  %v238_v9 = vld [vmem:[#allocation2 + $0x80] sm:$0xff]  ;;  %v2203_v11 = vsel %vm493_vm1, %v494_v2, 0  ;;  %v224_v21 = vld [vmem:[#allocation2 + $0x10] sm:$0xff]  ;;  %vm1121_vm3 = vcmask 1043456  }
  0x2d   : > { %s2050_s7 = smul.u32 40, %s2610_s16  ;;  %v246_v10 = vld [vmem:[#allocation2 + $0xc0] sm:$0x33]  ;;  %v1898_v12 = vcombine.high %v223_v5, %v231_v7  ;;  %v1897_v13 = vcombine.low %v223_v5, %v231_v7  ;;  %v239_v15 = vld [vmem:[#allocation2 + $0x88] sm:$0xff]  ;;  %v232_v22 = vld [vmem:[#allocation2 + $0x50] sm:$0xff]  ;;  %vm1114_vm4 = vcmask 293888  }
  0x2e   : > { %v1912_v14 = vcombine.high %v238_v9, %v246_v10  ;;  %v247_v16 = vld [vmem:[#allocation2 + $0xc8] sm:$0x33]  ;;  %v1911_v17 = vcombine.low %v238_v9, %v246_v10  ;;  %544 = vmatprep.subr.bf16.mxu0 %v1896_v6  ;;  %v225_v26 = vld [vmem:[#allocation2 + $0x18] sm:$0xff]  ;;  %v1900_v30 = vcombine.high %v224_v21, %v232_v22  ;;  %v240_v31 = vld [vmem:[#allocation2 + $0x90] sm:$0xff]  ;;  %v1899_v39 = vcombine.low %v224_v21, %v232_v22  ;;  %s1985_s21 = sshll.u32 %s2610_s16, 8 }
  0x2f   : > { %s2201_s10 = scalar_lea.vmem %s2597_s0, %s2050_s7  ;;  %v1914_v18 = vcombine.high %v239_v15, %v247_v16  ;;  %v1913_v19 = vcombine.low %v239_v15, %v247_v16  ;;  %605 = vmatprep.subr.bf16.mxu1 %v1898_v12  ;;  %545 = vmatpush1.bf16.msra.mxu0 %v1895_v8  ;;  %v233_v27 = vld [vmem:[#allocation2 + $0x58] sm:$0xff]  ;;  %v248_v32 = vld [vmem:[#allocation2 + $0xd0] sm:$0x33]  ;;  %v226_v44 = vld [vmem:[#allocation2 + $0x20] sm:$0xff]  ;;  %s2560_s24 = scalar_lea.vmem %s2601_s4, %s1985_s21 }
  0x30   : > { %v214_v20 = vld [vmem:[%s2201_s10] sm:$0xff]  ;;  %v500_v23 = vand.u32 %v1912_v14, %v2203_v11  ;;  %v497_v24 = vand.u32 %v1911_v17, %v2203_v11  ;;  %v215_v25 = vld [vmem:[%s2201_s10 + $0x8] sm:$0xff]  ;;  %606 = vmatpush1.bf16.msra.mxu1 %v1897_v13  ;;  %v1902_v33 = vcombine.high %v225_v26, %v233_v27  ;;  %v241_v34 = vld [vmem:[#allocation2 + $0x98] sm:$0xff]  ;;  %v1916_v37 = vcombine.high %v240_v31, %v248_v32 }
  0x31   : > { %v506_v28 = vand.u32 %v1914_v18, %v2203_v11  ;;  %v503_v29 = vand.u32 %v1913_v19, %v2203_v11  ;;  %v249_v35 = vld [vmem:[#allocation2 + $0xd8] sm:$0x33]  ;;  %v2211_v36 = vpack.c.bf16 %v215_v25, %v214_v20  ;;  %v1915_v40 = vcombine.low %v240_v31, %v248_v32  ;;  %v234_v45 = vld [vmem:[#allocation2 + $0x60] sm:$0xff]  ;;  %v227_v47 = vld [vmem:[#allocation2 + $0x28] sm:$0xff] }
  0x32   : > { %546 = vmatprep.subr.bf16.mxu0 %v500_v23  ;;  %v1918_v38 = vcombine.high %v241_v34, %v249_v35  ;;  %v1901_v41 = vcombine.low %v225_v26, %v233_v27  ;;  %v1917_v42 = vcombine.low %v241_v34, %v249_v35  ;;  %v512_v43 = vand.u32 %v1916_v37, %v2203_v11  ;;  %v235_v48 = vld [vmem:[#allocation2 + $0x68] sm:$0xff]  ;;  %v216_v49 = vld [vmem:[%s2201_s10 + $0x10] sm:$0xff]  ;;  %v217_v50 = vld [vmem:[%s2201_s10 + $0x18] sm:$0xff] }
  0x33   : > { %607 = vmatprep.subr.bf16.mxu1 %v506_v28  ;;  %547 = vmatpush1.bf16.msra.mxu0 %v497_v24  ;;  %v509_v51 = vand.u32 %v1915_v40, %v2203_v11  ;;  %v1904_v53 = vcombine.high %v226_v44, %v234_v45  ;;  %v1906_v54 = vcombine.high %v227_v47, %v235_v48  ;;  %v218_v56 = vld [vmem:[%s2201_s10 + $0x20] sm:$0xf]  ;;  %v243_v60 = vld [vmem:[#allocation2 + $0xa8] sm:$0xff]  ;;  %v228_v6 = vld [vmem:[#allocation2 + $0x30] sm:$0xff] }
  0x34   : > { %608 = vmatpush1.bf16.msra.mxu1 %v503_v29  ;;  %666 = vmatprep.subr.bf16.mxu0 %v1900_v30  ;;  %v518_v46 = vand.u32 %v1918_v38, %v2203_v11  ;;  %v515_v52 = vand.u32 %v1917_v42, %v2203_v11  ;;  %v2225_v55 = vpack.c.bf16 %v217_v50, %v216_v49  ;;  %v242_v58 = vld [vmem:[#allocation2 + $0xa0] sm:$0xff]  ;;  %v251_v61 = vld [vmem:[#allocation2 + $0xe8] sm:$0x33]  ;;  %v236_v7 = vld [vmem:[#allocation2 + $0x70] sm:$0xff]  ;;  %v258_v30 = vlaneseq }
  0x35   : > { %727 = vmatprep.subr.bf16.mxu1 %v1902_v33  ;;  %v2234_v57 = vpack.c.bf16 %v218_v56, %v218_v56  ;;  %v250_v59 = vld [vmem:[#allocation2 + $0xe0] sm:$0x33]  ;;  %v1922_v63 = vcombine.high %v243_v60, %v251_v61  ;;  %v1903_v1 = vcombine.low %v226_v44, %v234_v45  ;;  %v1905_v3 = vcombine.low %v227_v47, %v235_v48  ;;  %v229_v9 = vld [vmem:[#allocation2 + $0x38] sm:$0xff]  ;;  %v244_v16 = vld [vmem:[#allocation2 + $0xb0] sm:$0xff] }
  0x36   : > { %1927 = vmatmul.mubr.msk.bf16.vlgmr.msra.gmra.mrb[0].mxu0 %vm482_vm2, %v2211_v36  ;;  %v1920_v62 = vcombine.high %v242_v58, %v250_v59  ;;  %v1919_v2 = vcombine.low %v242_v58, %v250_v59  ;;  %v1921_v4 = vcombine.low %v243_v60, %v251_v61  ;;  %v237_v10 = vld [vmem:[#allocation2 + $0x78] sm:$0xff]  ;;  %v1908_v14 = vcombine.high %v228_v6, %v236_v7  ;;  %v252_v17 = vld [vmem:[#allocation2 + $0xf0] sm:$0x33] }
  0x37   : > { %1930 = vmatmul.mubr.msk.bf16.vlgmr.msra.gmra.mrb[0].mxu1 %vm482_vm2, %v2211_v36  ;;  %667 = vmatpush1.bf16.msra.mxu0 %v1899_v39  ;;  %v530_v8 = vand.u32 %v1922_v63, %v2203_v11  ;;  %v1910_v15 = vcombine.high %v229_v9, %v237_v10  ;;  %v245_v18 = vld [vmem:[#allocation2 + $0xb8] sm:$0xff]  ;;  %v1924_v20 = vcombine.high %v244_v16, %v252_v17  ;;  %v2304_v31 = vshrl.u32 %v258_v30, 7 }
  0x38   : > { %728 = vmatpush1.bf16.msra.mxu1 %v1901_v41  ;;  %586 = vmatprep.mubr.bf16.mxu0 %v2118_v0  ;;  %v524_v5 = vand.u32 %v1920_v62, %v2203_v11  ;;  %v521_v12 = vand.u32 %v1919_v2, %v2203_v11  ;;  %v527_v13 = vand.u32 %v1921_v4, %v2203_v11  ;;  %v253_v19 = vld [vmem:[#allocation2 + $0xf8] sm:$0x33] }
  0x39   : > { %647 = vmatprep.mubr.bf16.mxu1 %v2118_v0  ;;  %668 = vmatprep.subr.bf16.mxu0 %v512_v43  ;;  %v1926_v21 = vcombine.high %v245_v18, %v253_v19  ;;  %v1907_v22 = vcombine.low %v228_v6, %v236_v7  ;;  %v1923_v23 = vcombine.low %v244_v16, %v252_v17  ;;  %v260_v32 = vsub.s32 0, %v2304_v31 }
  0x3a   : > { %729 = vmatprep.subr.bf16.mxu1 %v518_v46  ;;  %v1909_v24 = vcombine.low %v229_v9, %v237_v10  ;;  %v1925_v25 = vcombine.low %v245_v18, %v253_v19  ;;  %v536_v26 = vand.u32 %v1924_v20, %v2203_v11  ;;  %v268_v33 = vsub.s32 2, %v2304_v31 }
  0x3b   : > { %669 = vmatpush1.bf16.msra.mxu0 %v509_v51  ;;  %v542_v27 = vand.u32 %v1926_v21, %v2203_v11  ;;  %v533_v28 = vand.u32 %v1923_v23, %v2203_v11  ;;  %v264_v34 = vsub.s32 1, %v2304_v31  ;;  %v272_v35 = vsub.s32 3, %v2304_v31 }
  0x3c   : > { %730 = vmatpush1.bf16.msra.mxu1 %v515_v52  ;;  %788 = vmatprep.subr.bf16.mxu0 %v1904_v53  ;;  %v539_v29 = vand.u32 %v1925_v25, %v2203_v11  ;;  %v2120_v11 = vmov 0.0  }
  0x3d   : > { %849 = vmatprep.subr.bf16.mxu1 %v1906_v54 }
  0x3e   : > { %1928 = vmatmul.mubr.msk.bf16.gmra.mrb[4].mxu0 %vm482_vm2, %v2225_v55 }
  0x3f   : > { %1931 = vmatmul.mubr.msk.bf16.gmra.mrb[4].mxu1 %vm482_vm2, %v2225_v55  ;;  %596 = vmatprep.mubr.bf16.mxu0 %v2118_v0 }
  0x40   : > { %657 = vmatprep.mubr.bf16.mxu1 %v2118_v0 }
  0x46   : > { %1929 = vmatmul.mubr.msk.bf16.gmra.mrb[8].mxu0 %vm482_vm2, %v2234_v57 }
  0x47   : > { %1932 = vmatmul.mubr.msk.bf16.gmra.mrb[8].mxu1 %vm482_vm2, %v2234_v57  ;;  %698 = vmatprep.mubr.bf16.mxu0 %v2118_v0 }
  0x48   : > { %759 = vmatprep.mubr.bf16.mxu1 %v2118_v0 }
  0x4e   : > { %1933 = vmatmul.mubr.msk.bf16.vlgmr.msra.gmra.mrb[12].mxu0 %vm482_vm2, %v2211_v36 }
  0x4f   : > { %1936 = vmatmul.mubr.msk.bf16.vlgmr.msra.gmra.mrb[12].mxu1 %vm482_vm2, %v2211_v36  ;;  %789 = vmatpush1.bf16.msra.mxu0 %v1903_v1 }
  0x50   : > { %850 = vmatpush1.bf16.msra.mxu1 %v1905_v3  ;;  %708 = vmatprep.mubr.bf16.mxu0 %v2118_v0 }
  0x51   : > { %769 = vmatprep.mubr.bf16.mxu1 %v2118_v0  ;;  %790 = vmatprep.subr.bf16.mxu0 %v524_v5 }
  0x52   : > { %851 = vmatprep.subr.bf16.mxu1 %v530_v8 }
  0x53   : > { %791 = vmatpush1.bf16.msra.mxu0 %v521_v12 }
  0x54   : > { %852 = vmatpush1.bf16.msra.mxu1 %v527_v13  ;;  %910 = vmatprep.subr.bf16.mxu0 %v1908_v14 }
  0x55   : > { %971 = vmatprep.subr.bf16.mxu1 %v1910_v15 }
  0x56   : > { %1934 = vmatmul.mubr.msk.bf16.gmra.mrb[16].mxu0 %vm482_vm2, %v2225_v55 }
  0x57   : > { %1937 = vmatmul.mubr.msk.bf16.gmra.mrb[16].mxu1 %vm482_vm2, %v2225_v55  ;;  %718 = vmatprep.mubr.bf16.mxu0 %v2118_v0 }
  0x58   : > { %779 = vmatprep.mubr.bf16.mxu1 %v2118_v0 }
  0x5e   : > { %1935 = vmatmul.mubr.msk.bf16.gmra.mrb[20].mxu0 %vm482_vm2, %v2234_v57 }
  0x5f   : > { %1938 = vmatmul.mubr.msk.bf16.gmra.mrb[20].mxu1 %vm482_vm2, %v2234_v57  ;;  %820 = vmatprep.mubr.bf16.mxu0 %v2118_v0 }
  0x60   : > { %881 = vmatprep.mubr.bf16.mxu1 %v2118_v0 }
  0x66   : > { %1939 = vmatmul.mubr.msk.bf16.vlgmr.msra.gmra.mrb[24].mxu0 %vm482_vm2, %v2211_v36 }
  0x67   : > { %1942 = vmatmul.mubr.msk.bf16.vlgmr.msra.gmra.mrb[24].mxu1 %vm482_vm2, %v2211_v36  ;;  %911 = vmatpush1.bf16.msra.mxu0 %v1907_v22 }
  0x68   : > { %972 = vmatpush1.bf16.msra.mxu1 %v1909_v24  ;;  %830 = vmatprep.mubr.bf16.mxu0 %v2118_v0 }
  0x69   : > { %891 = vmatprep.mubr.bf16.mxu1 %v2118_v0  ;;  %912 = vmatprep.subr.bf16.mxu0 %v536_v26 }
  0x6a   : > { %973 = vmatprep.subr.bf16.mxu1 %v542_v27 }
  0x6b   : > { %913 = vmatpush1.bf16.msra.mxu0 %v533_v28 }
  0x6c   : > { %974 = vmatpush1.bf16.msra.mxu1 %v539_v29 }
  0x6e   : > { %1940 = vmatmul.mubr.msk.bf16.gmra.mrb[28].mxu0 %vm482_vm2, %v2225_v55 }
  0x6f   : > { %1943 = vmatmul.mubr.msk.bf16.gmra.mrb[28].mxu1 %vm482_vm2, %v2225_v55  ;;  %840 = vmatprep.mubr.bf16.mxu0 %v2118_v0 }
  0x70   : > { %901 = vmatprep.mubr.bf16.mxu1 %v2118_v0 }
  0x76   : > { %1941 = vmatmul.mubr.msk.bf16.gmra.mrb[32].mxu0 %vm482_vm2, %v2234_v57 }
  0x77   : > { %1944 = vmatmul.mubr.msk.bf16.gmra.mrb[32].mxu1 %vm482_vm2, %v2234_v57  ;;  %942 = vmatprep.mubr.bf16.mxu0 %v2118_v0 }
  0x78   : > { %1003 = vmatprep.mubr.bf16.mxu1 %v2118_v0 }
  0x7e   : > { %1945 = vmatmul.mubr.msk.bf16.vlgmr.msra.gmra.mrb[36].mxu0 %vm482_vm2, %v2211_v36 }
  0x7f   : > { %1948 = vmatmul.mubr.msk.bf16.vlgmr.msra.gmra.mrb[36].mxu1 %vm482_vm2, %v2211_v36  ;;  %952 = vmatprep.mubr.bf16.mxu0 %v2118_v0 }
  0x80   : > { %1013 = vmatprep.mubr.bf16.mxu1 %v2118_v0 }
  0x86   : > { %1946 = vmatmul.mubr.msk.bf16.gmra.mrb[40].mxu0 %vm482_vm2, %v2225_v55 }
  0x87   : > { %1949 = vmatmul.mubr.msk.bf16.gmra.mrb[40].mxu1 %vm482_vm2, %v2225_v55  ;;  %962 = vmatprep.mubr.bf16.mxu0 %v2118_v0 }
  0x88   : > { %1023 = vmatprep.mubr.bf16.mxu1 %v2118_v0  ;;  %v2310_v0 = vld [vmem:[%s2599_s2] sm:$0xff] }
  0x89   : > { %v2318_v36 = vrot.slane %v2310_v0, %v260_v32  ;;  %v2323_v37 = vrot.slane %v2310_v0, %v268_v33  ;;  %v2328_v38 = vrot.slane %v2310_v0, %v264_v34  ;;  %v2333_v39 = vrot.slane %v2310_v0, %v272_v35 }
  0x8e   : > { %1947 = vmatmul.mubr.msk.bf16.gmra.mrb[44].mxu0 %vm482_vm2, %v2234_v57 }
  0x8f   : > { %1950 = vmatmul.mubr.msk.bf16.gmra.mrb[44].mxu1 %vm482_vm2, %v2234_v57  ;;  %1234 = vmatprep.mubr.f32.mxu0 %v2120_v11 }
  0x90   : > { %1311 = vmatprep.mubr.f32.mxu1 %v2120_v11 }
 0x109   : > { %v578_v40 = vpop.f32.mrb[0].mxu0 }
 0x10a   : > { %v579_v41 = vadd.f32 %v578_v40, %v2318_v36  ;;  %v639_v42 = vpop.f32.mrb[0].mxu1  ;;  %v580_v43 = vpop.f32.mrb[1].mxu0 }
 0x10b   : > { %v640_v44 = vadd.f32 %v639_v42, %v2323_v37  ;;  %v581_v45 = vadd.f32 %v580_v43, %v2328_v38  ;;  %v641_v46 = vpop.f32.mrb[1].mxu1  ;;  %v582_v47 = vpop.f32.mrb[2].mxu0 }
 0x10c   : > { %v642_v48 = vadd.f32 %v641_v46, %v2333_v39  ;;  %v583_v49 = vadd.f32 %v582_v47, %v2318_v36  ;;  %v643_v50 = vpop.f32.mrb[2].mxu1  ;;  %v584_v51 = vpop.f32.mrb[3].mxu0  ;;  %v1032_v55 = vmax.f32 %v579_v41, 0.0  ;;  %v276_v47 = vsub.s32 4, %v2304_v31 }
 0x10d   : > { %v644_v52 = vadd.f32 %v643_v50, %v2323_v37  ;;  %v585_v53 = vadd.f32 %v584_v51, %v2328_v38  ;;  %v645_v54 = vpop.f32.mrb[3].mxu1  ;;  %v1034_v58 = vmax.f32 %v640_v44, 0.0  ;;  %v1033_v59 = vmax.f32 %v581_v45, 0.0 }
 0x10e   : > { %v1048_v56 = vmax.f32 %v583_v49, 0.0  ;;  %v646_v57 = vadd.f32 %v645_v54, %v2333_v39  ;;  %v1035_v62 = vmax.f32 %v642_v48, 0.0 }
 0x10f   : > { %v1050_v60 = vmax.f32 %v644_v52, 0.0  ;;  %v1049_v61 = vmax.f32 %v585_v53, 0.0  ;;  %v284_v52 = vsub.s32 6, %v2304_v31  ;;  %v280_v53 = vsub.s32 5, %v2304_v31 }
 0x110   : > { %v1988_v63 = vpack.c.bf16 %v1048_v56, %v1032_v55  ;;  %v1051_v1 = vmax.f32 %v646_v57, 0.0  ;;  %v288_v56 = vsub.s32 7, %v2304_v31 }
 0x111   : > { %v1996_v2 = vpack.c.bf16 %v1050_v60, %v1034_v58  ;;  %v1986_v3 = vpack.c.bf16 %v1049_v61, %v1033_v59  ;;  %v588_v4 = vpop.f32.mrb[4].mxu0  ;;  %v2362_v59 = vrot.slane %v2310_v0, %v276_v47  ;;  %v2373_v61 = vrot.slane %v2310_v0, %v284_v52 }
 0x112   : > { %v1994_v5 = vpack.c.bf16 %v1051_v1, %v1035_v62  ;;  %v589_v6 = vadd.f32 %v588_v4, %v2318_v36  ;;  %v649_v7 = vpop.f32.mrb[4].mxu1  ;;  %v590_v8 = vpop.f32.mrb[5].mxu0  ;;  %v2378_v62 = vrot.slane %v2310_v0, %v280_v53 }
 0x113   : > { %v650_v9 = vadd.f32 %v649_v7, %v2323_v37  ;;  %v591_v10 = vadd.f32 %v590_v8, %v2328_v38  ;;  %v651_v12 = vpop.f32.mrb[5].mxu1  ;;  %v592_v13 = vpop.f32.mrb[6].mxu0  ;;  %1987 = vmatprep.subr.bf16.mxu0 %v1986_v3 }
 0x114   : > { %v652_v14 = vadd.f32 %v651_v12, %v2333_v39  ;;  %v593_v15 = vadd.f32 %v592_v13, %v2318_v36  ;;  %v653_v16 = vpop.f32.mrb[6].mxu1  ;;  %1995 = vmatprep.subr.bf16.mxu1 %v1994_v5  ;;  %v594_v17 = vpop.f32.mrb[7].mxu0  ;;  %1989 = vmatpush1.bf16.msra.mxu0 %v1988_v63  ;;  %v1064_v21 = vmax.f32 %v589_v6, 0.0  ;;  %v2385_v63 = vrot.slane %v2310_v0, %v288_v56  ;;  %v2397_v0 = vld [vmem:[%s2600_s3 + $0x8] sm:$0x1] }
 0x115   : > { %v654_v18 = vadd.f32 %v653_v16, %v2323_v37  ;;  %v595_v19 = vadd.f32 %v594_v17, %v2328_v38  ;;  %v655_v20 = vpop.f32.mrb[7].mxu1  ;;  %1997 = vmatpush1.bf16.msra.mxu1 %v1996_v2  ;;  %v1066_v24 = vmax.f32 %v650_v9, 0.0  ;;  %v1065_v25 = vmax.f32 %v591_v10, 0.0 }
 0x116   : > { %v1080_v22 = vmax.f32 %v593_v15, 0.0  ;;  %v656_v23 = vadd.f32 %v655_v20, %v2333_v39  ;;  %v1067_v28 = vmax.f32 %v652_v14, 0.0 }
 0x117   : > { %v1082_v26 = vmax.f32 %v654_v18, 0.0  ;;  %v1081_v27 = vmax.f32 %v595_v19, 0.0 }
 0x118   : > { %v1992_v29 = vpack.c.bf16 %v1080_v22, %v1064_v21  ;;  %v1083_v30 = vmax.f32 %v656_v23, 0.0 }
 0x119   : > { %v2000_v40 = vpack.c.bf16 %v1082_v26, %v1066_v24  ;;  %v1990_v41 = vpack.c.bf16 %v1081_v27, %v1065_v25  ;;  %v598_v42 = vpop.f32.mrb[8].mxu0 }
 0x11a   : > { %v1998_v43 = vpack.c.bf16 %v1083_v30, %v1067_v28  ;;  %v599_v44 = vadd.f32 %v598_v42, %v2318_v36  ;;  %v659_v45 = vpop.f32.mrb[8].mxu1  ;;  %v600_v46 = vpop.f32.mrb[9].mxu0 }
 0x11b   : > { %v660_v48 = vadd.f32 %v659_v45, %v2323_v37  ;;  %v601_v49 = vadd.f32 %v600_v46, %v2328_v38  ;;  %v661_v50 = vpop.f32.mrb[9].mxu1  ;;  %v602_v51 = vpop.f32.mrb[10].mxu0  ;;  %1991 = vmatprep.subr.bf16.mxu0 %v1990_v41 }
 0x11c   : > { %v662_v54 = vadd.f32 %v661_v50, %v2333_v39  ;;  %v663_v55 = vpop.f32.mrb[10].mxu1  ;;  %1999 = vmatprep.subr.bf16.mxu1 %v1998_v43  ;;  %v603_v36 = vpop.f32.mrb[11].mxu0  ;;  %1993 = vmatpush1.bf16.msra.mxu0 %v1992_v29  ;;  %v1096_v38 = vmax.f32 %v599_v44, 0.0  ;;  %v2367_v39 = vld [vmem:[%s2600_s3] sm:$0xff] }
 0x11d   : > { %v1097_v57 = vmax.f32 %v601_v49, 0.0  ;;  %v664_v37 = vpop.f32.mrb[11].mxu1  ;;  %2001 = vmatpush1.bf16.msra.mxu1 %v2000_v40  ;;  %v1098_v60 = vmax.f32 %v660_v48, 0.0 }
 0x11e   : > { %v1099_v58 = vmax.f32 %v662_v54, 0.0 }
 0x11f   : > { %1951 = vmatprep.subr.msk.mxu0 %vm1121_vm3, %v1097_v57 }
 0x120   : > { %1955 = vmatprep.subr.msk.mxu1 %vm1121_vm3, %v1099_v58  ;;  %1952 = vmatpush1.msk.msra.mxu0 %vm1121_vm3, %v1096_v38 }
 0x121   : > { %1956 = vmatpush1.msk.msra.mxu1 %vm1121_vm3, %v1098_v60  ;;  %v700_v1 = vpop.f32.mrb[12].mxu0  ;;  %1953 = vmatmul.mubr.msk.f32.vlgmr.msra.gmra.mrb[48].mxu0 %vm1114_vm4, %v2367_v39 }
 0x122   : > { %v701_v2 = vadd.f32 %v700_v1, %v2362_v59  ;;  %v761_v3 = vpop.f32.mrb[12].mxu1  ;;  %v702_v4 = vpop.f32.mrb[13].mxu0  ;;  %1957 = vmatmul.mubr.msk.f32.vlgmr.msra.gmra.mrb[48].mxu1 %vm1114_vm4, %v2367_v39  ;;  %1240 = vmatprep.mubr.f32.mxu0 %v2120_v11 }
 0x123   : > { %v762_v5 = vadd.f32 %v761_v3, %v2373_v61  ;;  %v703_v6 = vadd.f32 %v702_v4, %v2378_v62  ;;  %v763_v7 = vpop.f32.mrb[13].mxu1  ;;  %v704_v8 = vpop.f32.mrb[14].mxu0  ;;  %1317 = vmatprep.mubr.f32.mxu1 %v2120_v11 }
 0x124   : > { %v764_v9 = vadd.f32 %v763_v7, %v2385_v63  ;;  %v705_v10 = vadd.f32 %v704_v8, %v2362_v59  ;;  %v765_v12 = vpop.f32.mrb[14].mxu1  ;;  %v706_v13 = vpop.f32.mrb[15].mxu0  ;;  %v1036_v17 = vmax.f32 %v701_v2, 0.0 }
 0x125   : > { %v766_v14 = vadd.f32 %v765_v12, %v2373_v61  ;;  %v707_v15 = vadd.f32 %v706_v13, %v2378_v62  ;;  %v767_v16 = vpop.f32.mrb[15].mxu1  ;;  %1954 = vmatmul.mubr.msk.f32.gmra.mrb[50].mxu0 %vm1114_vm4, %v2397_v0  ;;  %v1038_v20 = vmax.f32 %v762_v5, 0.0  ;;  %v1037_v21 = vmax.f32 %v703_v6, 0.0 }
 0x126   : > { %v1052_v18 = vmax.f32 %v705_v10, 0.0  ;;  %v768_v19 = vadd.f32 %v767_v16, %v2385_v63  ;;  %1958 = vmatmul.mubr.msk.f32.gmra.mrb[50].mxu1 %vm1114_vm4, %v2397_v0  ;;  %1388 = vmatprep.mubr.f32.mxu0 %v2120_v11  ;;  %v1039_v24 = vmax.f32 %v764_v9, 0.0 }
 0x127   : > { %v1054_v22 = vmax.f32 %v766_v14, 0.0  ;;  %v1053_v23 = vmax.f32 %v707_v15, 0.0  ;;  %1465 = vmatprep.mubr.f32.mxu1 %v2120_v11 }
 0x128   : > { %v2004_v25 = vpack.c.bf16 %v1052_v18, %v1036_v17  ;;  %v1055_v26 = vmax.f32 %v768_v19, 0.0  ;;  %v2427_v18 = vld [vmem:[%s2599_s2 + $0x8] sm:$0xff] }
 0x129   : > { %v2012_v27 = vpack.c.bf16 %v1054_v22, %v1038_v20  ;;  %v2002_v28 = vpack.c.bf16 %v1053_v23, %v1037_v21  ;;  %v710_v29 = vpop.f32.mrb[16].mxu0 }
 0x12a   : > { %v2010_v30 = vpack.c.bf16 %v1055_v26, %v1039_v24  ;;  %v711_v40 = vadd.f32 %v710_v29, %v2362_v59  ;;  %v771_v41 = vpop.f32.mrb[16].mxu1  ;;  %v712_v42 = vpop.f32.mrb[17].mxu0 }
 0x12b   : > { %v772_v43 = vadd.f32 %v771_v41, %v2373_v61  ;;  %v713_v44 = vadd.f32 %v712_v42, %v2378_v62  ;;  %v773_v45 = vpop.f32.mrb[17].mxu1  ;;  %v714_v46 = vpop.f32.mrb[18].mxu0  ;;  %2003 = vmatprep.subr.bf16.mxu0 %v2002_v28 }
 0x12c   : > { %v774_v48 = vadd.f32 %v773_v45, %v2385_v63  ;;  %v715_v49 = vadd.f32 %v714_v46, %v2362_v59  ;;  %v775_v50 = vpop.f32.mrb[18].mxu1  ;;  %2011 = vmatprep.subr.bf16.mxu1 %v2010_v30  ;;  %v716_v51 = vpop.f32.mrb[19].mxu0  ;;  %2005 = vmatpush1.bf16.msra.mxu0 %v2004_v25  ;;  %v1068_v57 = vmax.f32 %v711_v40, 0.0  ;;  %v2444_v25 = vrot.slane %v2427_v18, %v264_v34 }
 0x12d   : > { %v776_v54 = vadd.f32 %v775_v50, %v2373_v61  ;;  %v717_v55 = vadd.f32 %v716_v51, %v2378_v62  ;;  %v777_v36 = vpop.f32.mrb[19].mxu1  ;;  %2013 = vmatpush1.bf16.msra.mxu1 %v2012_v27  ;;  %v1070_v58 = vmax.f32 %v772_v43, 0.0  ;;  %v1069_v60 = vmax.f32 %v713_v44, 0.0 }
 0x12e   : > { %v1084_v37 = vmax.f32 %v715_v49, 0.0  ;;  %v778_v38 = vadd.f32 %v777_v36, %v2385_v63  ;;  %v1071_v3 = vmax.f32 %v774_v48, 0.0 }
 0x12f   : > { %v1086_v1 = vmax.f32 %v776_v54, 0.0  ;;  %v1085_v2 = vmax.f32 %v717_v55, 0.0 }
 0x130   : > { %v2008_v4 = vpack.c.bf16 %v1084_v37, %v1068_v57  ;;  %v1087_v5 = vmax.f32 %v778_v38, 0.0 }
 0x131   : > { %v2016_v6 = vpack.c.bf16 %v1086_v1, %v1070_v58  ;;  %v2006_v7 = vpack.c.bf16 %v1085_v2, %v1069_v60  ;;  %v720_v8 = vpop.f32.mrb[20].mxu0 }
 0x132   : > { %v2014_v9 = vpack.c.bf16 %v1087_v5, %v1071_v3  ;;  %v721_v10 = vadd.f32 %v720_v8, %v2362_v59  ;;  %v781_v12 = vpop.f32.mrb[20].mxu1  ;;  %v722_v13 = vpop.f32.mrb[21].mxu0 }
 0x133   : > { %v782_v14 = vadd.f32 %v781_v12, %v2373_v61  ;;  %v723_v15 = vadd.f32 %v722_v13, %v2378_v62  ;;  %v783_v16 = vpop.f32.mrb[21].mxu1  ;;  %v724_v17 = vpop.f32.mrb[22].mxu0  ;;  %2007 = vmatprep.subr.bf16.mxu0 %v2006_v7  ;;  %v2433_v62 = vrot.slane %v2427_v18, %v260_v32  ;;  %v2451_v32 = vrot.slane %v2427_v18, %v272_v35 }
 0x134   : > { %v784_v19 = vadd.f32 %v783_v16, %v2385_v63  ;;  %v785_v20 = vpop.f32.mrb[22].mxu1  ;;  %2015 = vmatprep.subr.bf16.mxu1 %v2014_v9  ;;  %v725_v21 = vpop.f32.mrb[23].mxu0  ;;  %2009 = vmatpush1.bf16.msra.mxu0 %v2008_v4  ;;  %v1100_v61 = vmax.f32 %v721_v10, 0.0  ;;  %v2439_v63 = vrot.slane %v2427_v18, %v268_v33 }
 0x135   : > { %v1101_v59 = vmax.f32 %v723_v15, 0.0  ;;  %v786_v22 = vpop.f32.mrb[23].mxu1  ;;  %2017 = vmatpush1.bf16.msra.mxu1 %v2016_v6  ;;  %v1102_v24 = vmax.f32 %v782_v14, 0.0 }
 0x136   : > { %v1103_v23 = vmax.f32 %v784_v19, 0.0 }
 0x137   : > { %1959 = vmatprep.subr.msk.mxu0 %vm1121_vm3, %v1101_v59 }
 0x138   : > { %1963 = vmatprep.subr.msk.mxu1 %vm1121_vm3, %v1103_v23  ;;  %1960 = vmatpush1.msk.msra.mxu0 %vm1121_vm3, %v1100_v61 }
 0x139   : > { %1964 = vmatpush1.msk.msra.mxu1 %vm1121_vm3, %v1102_v24  ;;  %v822_v26 = vpop.f32.mrb[24].mxu0  ;;  %1961 = vmatmul.mubr.msk.f32.vlgmr.msra.gmra.mrb[52].mxu0 %vm1114_vm4, %v2367_v39 }
 0x13a   : > { %v823_v33 = vadd.f32 %v822_v26, %v2433_v62  ;;  %v883_v27 = vpop.f32.mrb[24].mxu1  ;;  %v824_v34 = vpop.f32.mrb[25].mxu0  ;;  %1965 = vmatmul.mubr.msk.f32.vlgmr.msra.gmra.mrb[52].mxu1 %vm1114_vm4, %v2367_v39  ;;  %1394 = vmatprep.mubr.f32.mxu0 %v2120_v11 }
 0x13b   : > { %v884_v28 = vadd.f32 %v883_v27, %v2439_v63  ;;  %v825_v35 = vadd.f32 %v824_v34, %v2444_v25  ;;  %v885_v29 = vpop.f32.mrb[25].mxu1  ;;  %v826_v30 = vpop.f32.mrb[26].mxu0  ;;  %1471 = vmatprep.mubr.f32.mxu1 %v2120_v11 }
 0x13c   : > { %v886_v40 = vadd.f32 %v885_v29, %v2451_v32  ;;  %v827_v41 = vadd.f32 %v826_v30, %v2433_v62  ;;  %v887_v42 = vpop.f32.mrb[26].mxu1  ;;  %v828_v43 = vpop.f32.mrb[27].mxu0  ;;  %v1040_v48 = vmax.f32 %v823_v33, 0.0 }
 0x13d   : > { %v888_v44 = vadd.f32 %v887_v42, %v2439_v63  ;;  %v829_v45 = vadd.f32 %v828_v43, %v2444_v25  ;;  %v889_v46 = vpop.f32.mrb[27].mxu1  ;;  %1962 = vmatmul.mubr.msk.f32.gmra.mrb[54].mxu0 %vm1114_vm4, %v2397_v0  ;;  %v1042_v51 = vmax.f32 %v884_v28, 0.0  ;;  %v1041_v54 = vmax.f32 %v825_v35, 0.0 }
 0x13e   : > { %v1056_v49 = vmax.f32 %v827_v41, 0.0  ;;  %v890_v50 = vadd.f32 %v889_v46, %v2451_v32  ;;  %1966 = vmatmul.mubr.msk.f32.gmra.mrb[54].mxu1 %vm1114_vm4, %v2397_v0  ;;  %1542 = vmatprep.mubr.f32.mxu0 %v2120_v11  ;;  %v1043_v57 = vmax.f32 %v886_v40, 0.0 }
 0x13f   : > { %v1058_v55 = vmax.f32 %v888_v44, 0.0  ;;  %v1057_v36 = vmax.f32 %v829_v45, 0.0  ;;  %1619 = vmatprep.mubr.f32.mxu1 %v2120_v11 }
 0x140   : > { %v2020_v37 = vpack.c.bf16 %v1056_v49, %v1040_v48  ;;  %v1059_v38 = vmax.f32 %v890_v50, 0.0 }
 0x141   : > { %v2028_v58 = vpack.c.bf16 %v1058_v55, %v1042_v51  ;;  %v2018_v60 = vpack.c.bf16 %v1057_v36, %v1041_v54  ;;  %v832_v1 = vpop.f32.mrb[28].mxu0  ;;  %v2500_v54 = vrot.slane %v2427_v18, %v280_v53 }
 0x142   : > { %v2026_v2 = vpack.c.bf16 %v1059_v38, %v1043_v57  ;;  %v833_v3 = vadd.f32 %v832_v1, %v2433_v62  ;;  %v893_v4 = vpop.f32.mrb[28].mxu1  ;;  %v834_v5 = vpop.f32.mrb[29].mxu0 }
 0x143   : > { %v894_v6 = vadd.f32 %v893_v4, %v2439_v63  ;;  %v835_v7 = vadd.f32 %v834_v5, %v2444_v25  ;;  %v895_v8 = vpop.f32.mrb[29].mxu1  ;;  %v836_v9 = vpop.f32.mrb[30].mxu0  ;;  %2019 = vmatprep.subr.bf16.mxu0 %v2018_v60 }
 0x144   : > { %v896_v10 = vadd.f32 %v895_v8, %v2451_v32  ;;  %v837_v12 = vadd.f32 %v836_v9, %v2433_v62  ;;  %v897_v13 = vpop.f32.mrb[30].mxu1  ;;  %2027 = vmatprep.subr.bf16.mxu1 %v2026_v2  ;;  %v838_v14 = vpop.f32.mrb[31].mxu0  ;;  %2021 = vmatpush1.bf16.msra.mxu0 %v2020_v37  ;;  %v1072_v19 = vmax.f32 %v833_v3, 0.0 }
 0x145   : > { %v898_v15 = vadd.f32 %v897_v13, %v2439_v63  ;;  %v839_v16 = vadd.f32 %v838_v14, %v2444_v25  ;;  %v899_v17 = vpop.f32.mrb[31].mxu1  ;;  %2029 = vmatpush1.bf16.msra.mxu1 %v2028_v58  ;;  %v1074_v59 = vmax.f32 %v894_v6, 0.0  ;;  %v1073_v22 = vmax.f32 %v835_v7, 0.0 }
 0x146   : > { %v1088_v20 = vmax.f32 %v837_v12, 0.0  ;;  %v900_v21 = vadd.f32 %v899_v17, %v2451_v32  ;;  %v1075_v24 = vmax.f32 %v896_v10, 0.0 }
 0x147   : > { %v1090_v61 = vmax.f32 %v898_v15, 0.0  ;;  %v1089_v23 = vmax.f32 %v839_v16, 0.0 }
 0x148   : > { %v2024_v26 = vpack.c.bf16 %v1088_v20, %v1072_v19  ;;  %v1091_v33 = vmax.f32 %v900_v21, 0.0 }
 0x149   : > { %v2032_v27 = vpack.c.bf16 %v1090_v61, %v1074_v59  ;;  %v2022_v34 = vpack.c.bf16 %v1089_v23, %v1073_v22  ;;  %v842_v28 = vpop.f32.mrb[32].mxu0 }
 0x14a   : > { %v2030_v35 = vpack.c.bf16 %v1091_v33, %v1075_v24  ;;  %v843_v29 = vadd.f32 %v842_v28, %v2433_v62  ;;  %v903_v30 = vpop.f32.mrb[32].mxu1  ;;  %v844_v40 = vpop.f32.mrb[33].mxu0 }
 0x14b   : > { %v904_v41 = vadd.f32 %v903_v30, %v2439_v63  ;;  %v845_v42 = vadd.f32 %v844_v40, %v2444_v25  ;;  %v905_v43 = vpop.f32.mrb[33].mxu1  ;;  %v846_v44 = vpop.f32.mrb[34].mxu0  ;;  %2023 = vmatprep.subr.bf16.mxu0 %v2022_v34  ;;  %v2489_v63 = vrot.slane %v2427_v18, %v276_v47  ;;  %v2507_v47 = vrot.slane %v2427_v18, %v288_v56 }
 0x14c   : > { %v906_v45 = vadd.f32 %v905_v43, %v2451_v32  ;;  %v907_v46 = vpop.f32.mrb[34].mxu1  ;;  %2031 = vmatprep.subr.bf16.mxu1 %v2030_v35  ;;  %v847_v48 = vpop.f32.mrb[35].mxu0  ;;  %2025 = vmatpush1.bf16.msra.mxu0 %v2024_v26  ;;  %v1104_v51 = vmax.f32 %v843_v29, 0.0  ;;  %v2495_v32 = vrot.slane %v2427_v18, %v284_v52 }
 0x14d   : > { %v1105_v49 = vmax.f32 %v845_v42, 0.0  ;;  %v908_v50 = vpop.f32.mrb[35].mxu1  ;;  %2033 = vmatpush1.bf16.msra.mxu1 %v2032_v27  ;;  %v1106_v25 = vmax.f32 %v904_v41, 0.0 }
 0x14e   : > { %v1107_v62 = vmax.f32 %v906_v45, 0.0 }
 0x14f   : > { %1967 = vmatprep.subr.msk.mxu0 %vm1121_vm3, %v1105_v49 }
 0x150   : > { %1971 = vmatprep.subr.msk.mxu1 %vm1121_vm3, %v1107_v62  ;;  %1968 = vmatpush1.msk.msra.mxu0 %vm1121_vm3, %v1104_v51 }
 0x151   : > { %1972 = vmatpush1.msk.msra.mxu1 %vm1121_vm3, %v1106_v25  ;;  %v944_v55 = vpop.f32.mrb[36].mxu0  ;;  %1969 = vmatmul.mubr.msk.f32.vlgmr.msra.gmra.mrb[56].mxu0 %vm1114_vm4, %v2367_v39 }
 0x152   : > { %v945_v52 = vadd.f32 %v944_v55, %v2489_v63  ;;  %v1005_v36 = vpop.f32.mrb[36].mxu1  ;;  %v946_v53 = vpop.f32.mrb[37].mxu0  ;;  %1973 = vmatmul.mubr.msk.f32.vlgmr.msra.gmra.mrb[56].mxu1 %vm1114_vm4, %v2367_v39  ;;  %1548 = vmatprep.mubr.f32.mxu0 %v2120_v11 }
 0x153   : > { %v1006_v31 = vadd.f32 %v1005_v36, %v2495_v32  ;;  %v947_v56 = vadd.f32 %v946_v53, %v2500_v54  ;;  %v1007_v18 = vpop.f32.mrb[37].mxu1  ;;  %v948_v57 = vpop.f32.mrb[38].mxu0  ;;  %1625 = vmatprep.mubr.f32.mxu1 %v2120_v11 }
 0x154   : > { %v1008_v37 = vadd.f32 %v1007_v18, %v2507_v47  ;;  %v949_v38 = vadd.f32 %v948_v57, %v2489_v63  ;;  %v1009_v58 = vpop.f32.mrb[38].mxu1  ;;  %v950_v60 = vpop.f32.mrb[39].mxu0  ;;  %v1044_v4 = vmax.f32 %v945_v52, 0.0 }
 0x155   : > { %v1010_v1 = vadd.f32 %v1009_v58, %v2495_v32  ;;  %v951_v2 = vadd.f32 %v950_v60, %v2500_v54  ;;  %v1011_v3 = vpop.f32.mrb[39].mxu1  ;;  %1970 = vmatmul.mubr.msk.f32.gmra.mrb[58].mxu0 %vm1114_vm4, %v2397_v0  ;;  %v1046_v7 = vmax.f32 %v1006_v31, 0.0  ;;  %v1045_v8 = vmax.f32 %v947_v56, 0.0 }
 0x156   : > { %v1060_v5 = vmax.f32 %v949_v38, 0.0  ;;  %v1012_v6 = vadd.f32 %v1011_v3, %v2507_v47  ;;  %1974 = vmatmul.mubr.msk.f32.gmra.mrb[58].mxu1 %vm1114_vm4, %v2397_v0  ;;  %1696 = vmatprep.mubr.f32.mxu0 %v2120_v11  ;;  %v1047_v12 = vmax.f32 %v1008_v37, 0.0 }
 0x157   : > { %v1062_v9 = vmax.f32 %v1010_v1, 0.0  ;;  %v1061_v10 = vmax.f32 %v951_v2, 0.0  ;;  %1773 = vmatprep.mubr.f32.mxu1 %v2120_v11 }
 0x158   : > { %v2036_v13 = vpack.c.bf16 %v1060_v5, %v1044_v4  ;;  %v1063_v14 = vmax.f32 %v1012_v6, 0.0 }
 0x159   : > { %v2044_v15 = vpack.c.bf16 %v1062_v9, %v1046_v7  ;;  %v2034_v16 = vpack.c.bf16 %v1061_v10, %v1045_v8  ;;  %v954_v17 = vpop.f32.mrb[40].mxu0 }
 0x15a   : > { %v2042_v19 = vpack.c.bf16 %v1063_v14, %v1047_v12  ;;  %v955_v20 = vadd.f32 %v954_v17, %v2489_v63  ;;  %v1015_v21 = vpop.f32.mrb[40].mxu1  ;;  %v956_v59 = vpop.f32.mrb[41].mxu0 }
 0x15b   : > { %v1016_v22 = vadd.f32 %v1015_v21, %v2495_v32  ;;  %v957_v61 = vadd.f32 %v956_v59, %v2500_v54  ;;  %v1017_v23 = vpop.f32.mrb[41].mxu1  ;;  %v958_v24 = vpop.f32.mrb[42].mxu0  ;;  %2035 = vmatprep.subr.bf16.mxu0 %v2034_v16 }
 0x15c   : > { %v1018_v26 = vadd.f32 %v1017_v23, %v2507_v47  ;;  %v959_v33 = vadd.f32 %v958_v24, %v2489_v63  ;;  %v1019_v27 = vpop.f32.mrb[42].mxu1  ;;  %2043 = vmatprep.subr.bf16.mxu1 %v2042_v19  ;;  %v960_v34 = vpop.f32.mrb[43].mxu0  ;;  %2037 = vmatpush1.bf16.msra.mxu0 %v2036_v13  ;;  %v1076_v30 = vmax.f32 %v955_v20, 0.0 }
 0x15d   : > { %v1020_v28 = vadd.f32 %v1019_v27, %v2495_v32  ;;  %v961_v35 = vadd.f32 %v960_v34, %v2500_v54  ;;  %v1021_v29 = vpop.f32.mrb[43].mxu1  ;;  %2045 = vmatpush1.bf16.msra.mxu1 %v2044_v15  ;;  %v1078_v42 = vmax.f32 %v1016_v22, 0.0  ;;  %v1077_v43 = vmax.f32 %v957_v61, 0.0 }
 0x15e   : > { %v1092_v40 = vmax.f32 %v959_v33, 0.0  ;;  %v1022_v41 = vadd.f32 %v1021_v29, %v2507_v47  ;;  %v1079_v46 = vmax.f32 %v1018_v26, 0.0 }
 0x15f   : > { %v1094_v44 = vmax.f32 %v1020_v28, 0.0  ;;  %v1093_v45 = vmax.f32 %v961_v35, 0.0 }
 0x160   : > { %v2040_v48 = vpack.c.bf16 %v1092_v40, %v1076_v30  ;;  %v1095_v49 = vmax.f32 %v1022_v41, 0.0 }
 0x161   : > { %v2048_v50 = vpack.c.bf16 %v1094_v44, %v1078_v42  ;;  %v2038_v51 = vpack.c.bf16 %v1093_v45, %v1077_v43  ;;  %v964_v62 = vpop.f32.mrb[44].mxu0 }
 0x162   : > { %v2046_v25 = vpack.c.bf16 %v1095_v49, %v1079_v46  ;;  %v965_v55 = vadd.f32 %v964_v62, %v2489_v63  ;;  %v1025_v52 = vpop.f32.mrb[44].mxu1  ;;  %v966_v36 = vpop.f32.mrb[45].mxu0 }
 0x163   : > { %v1026_v53 = vadd.f32 %v1025_v52, %v2495_v32  ;;  %v967_v31 = vadd.f32 %v966_v36, %v2500_v54  ;;  %v1027_v56 = vpop.f32.mrb[45].mxu1  ;;  %v968_v18 = vpop.f32.mrb[46].mxu0  ;;  %2039 = vmatprep.subr.bf16.mxu0 %v2038_v51 }
 0x164   : > { %v1028_v57 = vadd.f32 %v1027_v56, %v2507_v47  ;;  %v1029_v37 = vpop.f32.mrb[46].mxu1  ;;  %2047 = vmatprep.subr.bf16.mxu1 %v2046_v25  ;;  %v969_v38 = vpop.f32.mrb[47].mxu0  ;;  %2041 = vmatpush1.bf16.msra.mxu0 %v2040_v48  ;;  %v1108_v63 = vmax.f32 %v965_v55, 0.0 }
 0x165   : > { %v1109_v58 = vmax.f32 %v967_v31, 0.0  ;;  %v1030_v60 = vpop.f32.mrb[47].mxu1  ;;  %2049 = vmatpush1.bf16.msra.mxu1 %v2048_v50  ;;  %v1110_v2 = vmax.f32 %v1026_v53, 0.0 }
 0x166   : > { %v1111_v1 = vmax.f32 %v1028_v57, 0.0 }
 0x167   : > { %1975 = vmatprep.subr.msk.mxu0 %vm1121_vm3, %v1109_v58 }
 0x168   : > { %1979 = vmatprep.subr.msk.mxu1 %vm1121_vm3, %v1111_v1  ;;  %1976 = vmatpush1.msk.msra.mxu0 %vm1121_vm3, %v1108_v63 }
 0x169   : > { %1980 = vmatpush1.msk.msra.mxu1 %vm1121_vm3, %v1110_v2  ;;  %1977 = vmatmul.mubr.msk.f32.vlgmr.msra.gmra.mrb[60].mxu0 %vm1114_vm4, %v2367_v39 }
 0x16a   : > { %1981 = vmatmul.mubr.msk.f32.vlgmr.msra.gmra.mrb[60].mxu1 %vm1114_vm4, %v2367_v39  ;;  %1702 = vmatprep.mubr.f32.mxu0 %v2120_v11 }
 0x16b   : > { %1779 = vmatprep.mubr.f32.mxu1 %v2120_v11 }
 0x16d   : > { %1978 = vmatmul.mubr.msk.f32.gmra.mrb[62].mxu0 %vm1114_vm4, %v2397_v0 }
 0x16e   : > { %1982 = vmatmul.mubr.msk.f32.gmra.mrb[62].mxu1 %vm1114_vm4, %v2397_v0 }
 0x1f4   : > { %v1236_v11 = vpop.f32.mrb[48].mxu0 }
 0x1f5   : > { %1786 = vst [vmem:[%s2560_s24] sm:$0xff] %v1236_v11  ;;  %v1313_v39 = vpop.f32.mrb[48].mxu1  ;;  %v1238_v32 = vpop.f32.mrb[49].mxu0 }
 0x1f6   : > { %1788 = vst [vmem:[%s2560_s24 + $0x10] sm:$0xff] %v1313_v39  ;;  %1787 = vst [vmem:[%s2560_s24 + $0x8] sm:$0xff] %v1238_v32  ;;  %v1315_v0 = vpop.f32.mrb[49].mxu1 }
 0x1f7   : > { %1789 = vst [vmem:[%s2560_s24 + $0x18] sm:$0xff] %v1315_v0 }
 0x1f8   : > { %v1242_v54 = vpop.f32.mrb[50].mxu0 }
 0x1f9   : > { %1802 = vst [vmem:[%s2560_s24 + $0x80] sm:$0x1] %v1242_v54  ;;  %v1319_v47 = vpop.f32.mrb[50].mxu1  ;;  %v1244_v3 = vpop.f32.mrb[51].mxu0 }
 0x1fa   : > { %1804 = vst [vmem:[%s2560_s24 + $0x90] sm:$0x1] %v1319_v47  ;;  %1803 = vst [vmem:[%s2560_s24 + $0x88] sm:$0x1] %v1244_v3  ;;  %v1321_v4 = vpop.f32.mrb[51].mxu1 }
 0x1fb   : > { %1805 = vst [vmem:[%s2560_s24 + $0x98] sm:$0x1] %v1321_v4 }
 0x20c   : > { %v1390_v5 = vpop.f32.mrb[52].mxu0 }
 0x20d   : > { %1790 = vst [vmem:[%s2560_s24 + $0x20] sm:$0xff] %v1390_v5  ;;  %v1467_v6 = vpop.f32.mrb[52].mxu1  ;;  %v1392_v7 = vpop.f32.mrb[53].mxu0 }
 0x20e   : > { %1792 = vst [vmem:[%s2560_s24 + $0x30] sm:$0xff] %v1467_v6  ;;  %1791 = vst [vmem:[%s2560_s24 + $0x28] sm:$0xff] %v1392_v7  ;;  %v1469_v8 = vpop.f32.mrb[53].mxu1 }
 0x20f   : > { %1793 = vst [vmem:[%s2560_s24 + $0x38] sm:$0xff] %v1469_v8 }
 0x210   : > { %v1396_v9 = vpop.f32.mrb[54].mxu0 }
 0x211   : > { %1806 = vst [vmem:[%s2560_s24 + $0xa0] sm:$0x1] %v1396_v9  ;;  %v1473_v10 = vpop.f32.mrb[54].mxu1  ;;  %v1398_v12 = vpop.f32.mrb[55].mxu0 }
 0x212   : > { %1808 = vst [vmem:[%s2560_s24 + $0xb0] sm:$0x1] %v1473_v10  ;;  %1807 = vst [vmem:[%s2560_s24 + $0xa8] sm:$0x1] %v1398_v12  ;;  %v1475_v13 = vpop.f32.mrb[55].mxu1 }
 0x213   : > { %1809 = vst [vmem:[%s2560_s24 + $0xb8] sm:$0x1] %v1475_v13 }
 0x224   : > { %v1544_v14 = vpop.f32.mrb[56].mxu0 }
 0x225   : > { %1794 = vst [vmem:[%s2560_s24 + $0x40] sm:$0xff] %v1544_v14  ;;  %v1621_v15 = vpop.f32.mrb[56].mxu1  ;;  %v1546_v16 = vpop.f32.mrb[57].mxu0 }
 0x226   : > { %1796 = vst [vmem:[%s2560_s24 + $0x50] sm:$0xff] %v1621_v15  ;;  %1795 = vst [vmem:[%s2560_s24 + $0x48] sm:$0xff] %v1546_v16  ;;  %v1623_v17 = vpop.f32.mrb[57].mxu1 }
 0x227   : > { %1797 = vst [vmem:[%s2560_s24 + $0x58] sm:$0xff] %v1623_v17 }
 0x228   : > { %v1550_v19 = vpop.f32.mrb[58].mxu0 }
 0x229   : > { %1810 = vst [vmem:[%s2560_s24 + $0xc0] sm:$0x1] %v1550_v19  ;;  %v1627_v20 = vpop.f32.mrb[58].mxu1  ;;  %v1552_v21 = vpop.f32.mrb[59].mxu0 }
 0x22a   : > { %1812 = vst [vmem:[%s2560_s24 + $0xd0] sm:$0x1] %v1627_v20  ;;  %1811 = vst [vmem:[%s2560_s24 + $0xc8] sm:$0x1] %v1552_v21  ;;  %v1629_v59 = vpop.f32.mrb[59].mxu1 }
 0x22b   : > { %1813 = vst [vmem:[%s2560_s24 + $0xd8] sm:$0x1] %v1629_v59 }
 0x23c   : > { %v1698_v22 = vpop.f32.mrb[60].mxu0 }
 0x23d   : > { %1798 = vst [vmem:[%s2560_s24 + $0x60] sm:$0xff] %v1698_v22  ;;  %v1775_v61 = vpop.f32.mrb[60].mxu1  ;;  %v1700_v23 = vpop.f32.mrb[61].mxu0 }
 0x23e   : > { %1800 = vst [vmem:[%s2560_s24 + $0x70] sm:$0xff] %v1775_v61  ;;  %1799 = vst [vmem:[%s2560_s24 + $0x68] sm:$0xff] %v1700_v23  ;;  %v1777_v24 = vpop.f32.mrb[61].mxu1 }
 0x23f   : > { %1801 = vst [vmem:[%s2560_s24 + $0x78] sm:$0xff] %v1777_v24 }
 0x240   : > { %v1704_v26 = vpop.f32.mrb[62].mxu0 }
 0x241   : > { %1814 = vst [vmem:[%s2560_s24 + $0xe0] sm:$0x1] %v1704_v26  ;;  %v1781_v33 = vpop.f32.mrb[62].mxu1  ;;  %v1706_v27 = vpop.f32.mrb[63].mxu0 }
 0x242   : > { %1816 = vst [vmem:[%s2560_s24 + $0xf0] sm:$0x1] %v1781_v33  ;;  %1815 = vst [vmem:[%s2560_s24 + $0xe8] sm:$0x1] %v1706_v27  ;;  %v1783_v34 = vpop.f32.mrb[63].mxu1 }
 0x243   : > { %1817 = vst [vmem:[%s2560_s24 + $0xf8] sm:$0x1] %v1783_v34 }
 0x244 PF: > { %s15_s15 = sadd.s32 1, %s2113_s15  }
 0x245   : > { %p12_p3 = scmp.ge.s32.totalorder %s15_s15, 4  }
 0x247   :  { %14 = sbr.rel (!%p12_p3) target bundleno = 1 (0x1), region = 71 }
 0x24e   :  { %1839 = vsyncpa [#allocation3], 1 }
 0x24f   :  { %1841 = vsyncpa [#allocation3 + $0x1], 1 }

</bundles_post_ra>
